<compile_context>
chip_gen: v5e
topology: v5e:2x2
jax: 0.10.0
libtpu: 0.0.40
codegen_flags: <defaults>
</compile_context>

<pallas_src>
import math

import jax
import jax.numpy as jnp
from jax.experimental import pallas as pl
from jax.experimental.pallas import tpu as pltpu

_TWO_PI = 2.0 * math.pi


def _posenc_kernel(x_ref, params_ref, o_ref):
    # x_ref:      (tb, 1)     f32  timesteps
    # params_ref: (3, width)  f32  row0 = [0 | w | w]
    #                              row1 = [0 | 0..0 | pi/2..pi/2]
    #                              row2 = [1 | 0..0 | 0..0]   (x-column mask)
    # o_ref:      (tb, width) f32  [x | sin(x*w*2pi) | cos(x*w*2pi)]
    x = x_ref[...]                         # (tb, 1)
    w = params_ref[0:1, :]                 # (1, width)
    p = params_ref[1:2, :]                 # (1, width)
    is_x_col = params_ref[2:3, :]          # (1, width)
    t = x * w * _TWO_PI + p                # outer-product broadcast on VPU
    # One EUP pass (sin covers both sin & cos halves); x column via VPU select.
    o_ref[...] = jnp.where(is_x_col > 0.5, x, jnp.sin(t))


def _pick_batch_tile(b8, block_b):
    """Largest tile (multiple of 8, <= block_b) that ideally divides b8."""
    if b8 <= block_b:
        return b8
    cap = block_b - (block_b % 8)
    lo = max(8, cap // 4)
    d = cap
    while d >= lo:
        if b8 % d == 0:
            return d            # exact tiling: no pad, no output slice
        d -= 8
    return cap                  # fall back to padding


def random_or_learned_sinusoidal_pos_enc(x, weights, *, block_b=512):
    """x: (b,) ; weights: (half_dim,) -> (b, 1 + 2*half_dim) float32."""
    b = x.shape[0]
    half_dim = weights.shape[0]
    width = 1 + 2 * half_dim

    x32 = x.astype(jnp.float32)
    w32 = weights.astype(jnp.float32)

    # Packed per-column parameters: multipliers, phase offsets, x-column mask.
    zero1 = jnp.zeros((1,), jnp.float32)
    w_ext = jnp.concatenate([zero1, w32, w32]).reshape(1, width)
    p_ext = jnp.concatenate(
        [zero1,
         jnp.zeros((half_dim,), jnp.float32),
         jnp.full((half_dim,), math.pi / 2.0, dtype=jnp.float32)]
    ).reshape(1, width)
    m_ext = jnp.concatenate(
        [jnp.ones((1,), jnp.float32), jnp.zeros((2 * half_dim,), jnp.float32)]
    ).reshape(1, width)
    params = jnp.concatenate([w_ext, p_ext, m_ext], axis=0)   # (3, width)

    # Batch tiling: 8-row aligned, large tiles, avoid padding when possible.
    b8 = pl.cdiv(b, 8) * 8
    tb = _pick_batch_tile(b8, block_b)
    b_pad = pl.cdiv(b8, tb) * tb

    x2 = x32.reshape(b, 1)
    if b_pad != b:
        x2 = jnp.pad(x2, ((0, b_pad - b), (0, 0)))

    out = pl.pallas_call(
        _posenc_kernel,
        out_shape=jax.ShapeDtypeStruct((b_pad, width), jnp.float32),
        grid=(b_pad // tb,),
        in_specs=[
            pl.BlockSpec((tb, 1), lambda i: (i, 0)),
            pl.BlockSpec((3, width), lambda i: (0, 0)),   # VMEM-resident params
        ],
        out_specs=pl.BlockSpec((tb, width), lambda i: (i, 0)),
        compiler_params=pltpu.CompilerParams(
            dimension_semantics=("parallel",)),            # v7x: shard over 2 TCs
    )(x2, params)

    if b_pad != b:
        out = out[:b]
    return out


def reference(x, weights):
    x2 = x.reshape(-1, 1).astype(jnp.float32)
    w = weights.reshape(1, -1).astype(jnp.float32)
    freqs = x2 * w * 2.0 * math.pi
    return jnp.concatenate([x2, jnp.sin(freqs), jnp.cos(freqs)], axis=-1)


if __name__ == "__main__":
    dim = 32                 # must be even; half_dim = 16
    key = jax.random.PRNGKey(0)
    kx, kw, kx2 = jax.random.split(key, 3)

    # Deterministic "parameter" init (nn.Parameter(torch.randn(half_dim)))
    weights = jax.random.normal(kw, (dim // 2,), dtype=jnp.float32)

    # Case 1: tiny batch (single tile, grid=(1,))
    batch = 8
    x = jax.random.uniform(kx, (batch,), dtype=jnp.float32)
    out = jax.block_until_ready(random_or_learned_sinusoidal_pos_enc(x, weights))
    ref = reference(x, weights)
    assert out.shape == (batch, 1 + dim), out.shape
    assert jnp.allclose(out, ref, atol=1e-5, rtol=1e-5), "mismatch vs reference (b=8)"

    # Case 2: larger batch exercising the multi-step grid (exact-divisor tiling)
    batch2 = 1000
    x2 = jax.random.uniform(kx2, (batch2,), dtype=jnp.float32)
    out2 = jax.block_until_ready(random_or_learned_sinusoidal_pos_enc(x2, weights))
    ref2 = reference(x2, weights)
    assert out2.shape == (batch2, 1 + dim), out2.shape
    assert jnp.allclose(out2, ref2, atol=1e-5, rtol=1e-5), "mismatch vs reference (b=1000)"

    print("KERNEL_OK")
</pallas_src>

<mosaic_0001>
module attributes {stable_mosaic.version = 11 : i64} {
  func.func @_posenc_kernel(%arg0: i32, %arg1: memref<8x1xf32, #tpu.memory_space<vmem>>, %arg2: memref<3x33xf32, #tpu.memory_space<vmem>>, %arg3: memref<8x33xf32, #tpu.memory_space<vmem>>) attributes {dimension_semantics = [#tpu.dimension_semantics<parallel>], iteration_bounds = array<i64: 1>, scalar_prefetch = 0 : i64, scratch_operands = 0 : i64, tpu.core_type = #tpu.core_type<tc>, window_params = [{transform_indices = @transform_0, window_bounds = array<i64: 8, 1>}, {pipeline_mode = #tpu.pipeline_mode<synchronous>, transform_indices = @transform_1, window_bounds = array<i64: 3, 33>}, {transform_indices = @transform_2, window_bounds = array<i64: 8, 33>}]} {
    %c0 = arith.constant 0 : index
    %c0_0 = arith.constant 0 : index
    %0 = vector.load %arg1[%c0, %c0_0] : memref<8x1xf32, #tpu.memory_space<vmem>>, vector<8x1xf32>
    %c0_1 = arith.constant 0 : index
    %c0_2 = arith.constant 0 : index
    %1 = vector.load %arg2[%c0_1, %c0_2] : memref<3x33xf32, #tpu.memory_space<vmem>>, vector<1x33xf32>
    %c1 = arith.constant 1 : index
    %c0_3 = arith.constant 0 : index
    %2 = vector.load %arg2[%c1, %c0_3] : memref<3x33xf32, #tpu.memory_space<vmem>>, vector<1x33xf32>
    %c2 = arith.constant 2 : index
    %c0_4 = arith.constant 0 : index
    %3 = vector.load %arg2[%c2, %c0_4] : memref<3x33xf32, #tpu.memory_space<vmem>>, vector<1x33xf32>
    %4 = vector.broadcast %0 : vector<8x1xf32> to vector<8x33xf32>
    %5 = vector.broadcast %1 : vector<1x33xf32> to vector<8x33xf32>
    %6 = arith.mulf %4, %5 : vector<8x33xf32>
    %cst = arith.constant 6.28318548 : f32
    %7 = vector.broadcast %cst : f32 to vector<8x33xf32>
    %8 = arith.mulf %6, %7 : vector<8x33xf32>
    %9 = vector.broadcast %2 : vector<1x33xf32> to vector<8x33xf32>
    %10 = arith.addf %8, %9 : vector<8x33xf32>
    %cst_5 = arith.constant 5.000000e-01 : f32
    %11 = vector.broadcast %cst_5 : f32 to vector<1x33xf32>
    %12 = arith.cmpf ogt, %3, %11 : vector<1x33xf32>
    %13 = math.sin %10 : vector<8x33xf32>
    %14 = vector.shape_cast %12 : vector<1x33xi1> to vector<1x33xi1>
    %15 = vector.broadcast %14 : vector<1x33xi1> to vector<8x33xi1>
    %16 = vector.shape_cast %0 : vector<8x1xf32> to vector<8x1xf32>
    %17 = vector.broadcast %16 : vector<8x1xf32> to vector<8x33xf32>
    %18 = arith.select %15, %17, %13 : vector<8x33xi1>, vector<8x33xf32>
    %c0_6 = arith.constant 0 : index
    %c0_7 = arith.constant 0 : index
    %19 = vector.load %arg3[%c0_6, %c0_7] : memref<8x33xf32, #tpu.memory_space<vmem>>, vector<8x33xf32>
    tpu.vector_store %arg3[%c0_6, %c0_7], %18 {strides = array<i32>} : memref<8x33xf32, #tpu.memory_space<vmem>>, vector<8x33xf32>,
    return
  }
  func.func @transform_0(%arg0: i32) -> (i32, i32) {
    %c0_i32 = arith.constant 0 : i32
    %c0_i32_0 = arith.constant 0 : i32
    return %arg0, %c0_i32 : i32, i32
  }
  func.func @transform_1(%arg0: i32) -> (i32, i32) {
    %c0_i32 = arith.constant 0 : i32
    %c0_i32_0 = arith.constant 0 : i32
    %c0_i32_1 = arith.constant 0 : i32
    return %c0_i32, %c0_i32_0 : i32, i32
  }
  func.func @transform_2(%arg0: i32) -> (i32, i32) {
    %c0_i32 = arith.constant 0 : i32
    %c0_i32_0 = arith.constant 0 : i32
    return %arg0, %c0_i32 : i32, i32
  }
}

</mosaic_0001>

<bundles_post_ra>
// kernel: tpu_custom_call.1
= control target key start
LH: loop header
LB: loop body
LE: loop exit
PB: predicated region body
PF: predicated region fallthrough
CT: control target
= control target key end

     0   :  { %v244_v1 = vmov 0   ;;  %s356_s0 = inlined_call_operand.vmem [shape: f32[8,1], index: 0, kind: input, shape index: {}]   ;;  %s357_s1 = inlined_call_operand.vmem [shape: f32[3,33], index: 1, kind: input, shape index: {}]   ;;  %s358_s2 = inlined_call_operand.hbm [shape: f32[8,33], index: 2, kind: output, shape index: {}]  }
   0x1   :  { %v12_v0 = vld [vmem:[%s356_s0] sm:$0xff]  ;;  %215 = vset.pattern.permute.xlu0 %v244_v1 }
   0x2   :  { %18 = vperm.xlu0 %215, %v12_v0  }
   0x3   :  { %7 = vsyncpa [#allocation3], 0  ;;  %v216_v2 = vld [vmem:[%s357_s1] ss:$0 sm:$0xff]  ;;  %v217_v4 = vld [vmem:[%s357_s1 + $0x1] ss:$0 sm:$0xff] }
   0x4   :  { %v245_v19 = vmov 683565275   ;;  %v246_v21 = vmov 2475754826   ;;  %v247_v24 = vmov 2131351028  }
   0x5   :  { %v248_v27 = vmov 2102212464   ;;  %v249_v30 = vmov 920167782   ;;  %v250_v33 = vmov 1326507024  }
   0x6   :  { %s195_s19 = sshll.u32 %s358_s2, 4  ;;  %s196_s19 = int_to_ptr.hbm [resolvable:$true] %s195_s19 }
  0x74   :  { %v274_v3 = vpop.permute.xlu0 %18 }
  0x75   :  { %v22_v5 = vmul.f32 %v216_v2, %v274_v3 }
  0x77   :  { %v23_v6 = vmul.f32 6.2831855, %v22_v5 }
  0x79   :  { %v280_v7 = vadd.f32 %v217_v4, %v23_v6 }
  0x7b   :  { %v30_v8 = vand.u32 2139095040, %v280_v7  ;;  %v27_v11 = vand.u32 2147483647, %v280_v7  ;;  %vm29_vm12 = vcmp.lt.s32.totalorder %v280_v7, 0 }
  0x7d   :  { %v31_v9 = vshrl.u32 %v30_v8, 23  ;;  %v34_v13 = vand.u32 8388607, %v27_v11  ;;  %vm338_vm13 = vcmp.le.f32.partialorder %v27_v11, 0.7853982 }
  0x7f   :  { %v204_v10 = vadd.s32 4294967169, %v31_v9  ;;  %v35_v17 = vor.u32 8388608, %v34_v13 }
  0x81   :  { %v37_v12 = vadd.s32 1, %v204_v10  ;;  %v297_v40 = vshll.u32 %v35_v17, 8 }
  0x83   :  { %vm38_vm0 = vcmp.gt.s32.totalorder %v37_v12, 0  ;;  %v76_v49 = vand.u32 65535, %v297_v40  ;;  %v77_v50 = vshrl.u32 %v297_v40, 16 }
  0x84   :  { %v39_v14 = vsel %vm38_vm0, %v37_v12, 0 }
  0x85   :  { %v41_v15 = vand.u32 31, %v39_v14  ;;  %v288_v18 = vshrl.u32 %v39_v14, 5 }
  0x87   :  { %v286_v16 = vsub.s32 32, %v41_v15  ;;  %v44_v20 = vshll.u32 %v245_v19, %v41_v15  ;;  %v47_v22 = vshll.u32 %v246_v21, %v41_v15  ;;  %v50_v26 = vshll.u32 %v247_v24, %v41_v15 }
  0x88   :  { %v53_v29 = vshll.u32 %v248_v27, %v41_v15  ;;  %v56_v32 = vshll.u32 %v249_v30, %v41_v15  ;;  %vm59_vm1 = vcmp.lt.s32.totalorder %v288_v18, 1  ;;  %vm62_vm2 = vcmp.lt.s32.totalorder %v288_v18, 4 }
  0x89   :  { %v45_v23 = vshrl.u32 %v246_v21, %v286_v16  ;;  %v48_v25 = vshrl.u32 %v247_v24, %v286_v16  ;;  %v51_v28 = vshrl.u32 %v248_v27, %v286_v16  ;;  %v54_v31 = vshrl.u32 %v249_v30, %v286_v16 }
  0x8a   :  { %v57_v34 = vshrl.u32 %v250_v33, %v286_v16  ;;  %vm61_vm3 = vcmp.lt.s32.totalorder %v288_v18, 3  ;;  %vm60_vm4 = vcmp.lt.s32.totalorder %v288_v18, 2  ;;  %v43_v15 = vshrl.u32 %v245_v19, %v286_v16 }
  0x8b   :  { %v46_v35 = vor.u32 %v45_v23, %v44_v20  ;;  %v49_v36 = vor.u32 %v48_v25, %v47_v22  ;;  %v52_v37 = vor.u32 %v51_v28, %v50_v26  ;;  %v55_v38 = vor.u32 %v54_v31, %v53_v29 }
  0x8c   :  { %v58_v39 = vor.u32 %v57_v34, %v56_v32 }
  0x8d   :  { %v67_v41 = vsel %vm59_vm1, %v46_v35, %v49_v36  ;;  %v71_v42 = vsel %vm59_vm1, %v49_v36, %v52_v37  ;;  %v68_v43 = vsel %vm62_vm2, %v55_v38, 920167782  ;;  %v64_v12 = vsel %vm62_vm2, %v52_v37, 2102212464 }
  0x8e   :  { %v72_v44 = vsel %vm62_vm2, %v58_v39, 1326507024  ;;  %v69_v45 = vsel %vm61_vm3, %v52_v37, %v68_v43  ;;  %v63_v24 = vsel %vm59_vm1, %v43_v15, %v46_v35  ;;  %v65_v25 = vsel %vm61_vm3, %v49_v36, %v64_v12 }
  0x8f   :  { %v73_v46 = vsel %vm61_vm3, %v55_v38, %v72_v44  ;;  %v70_v47 = vsel %vm60_vm4, %v67_v41, %v69_v45  ;;  %v66_v16 = vsel %vm60_vm4, %v63_v24, %v65_v25  ;;  %vm186_vm3 = vcmask 269312  }
  0x90   :  { %v74_v48 = vsel %vm60_vm4, %v71_v42, %v73_v46  ;;  %v100_v53 = vand.u32 65535, %v70_v47  ;;  %v101_v54 = vshrl.u32 %v70_v47, 16  ;;  %v120_v33 = vmul.u32 %v297_v40, %v66_v16 }
  0x91   :  { %v78_v51 = vand.u32 65535, %v74_v48  ;;  %v79_v52 = vshrl.u32 %v74_v48, 16  ;;  %vm170_vm4 = vweird.f32 %v280_v7 }
  0x92   :  { %v103_v57 = vmul.u32 %v101_v54, %v76_v49  ;;  %v104_v58 = vmul.u32 %v100_v53, %v77_v50  ;;  %v102_v62 = vmul.u32 %v100_v53, %v76_v49  ;;  %v105_v4 = vmul.u32 %v101_v54, %v77_v50 }
  0x93   :  { %v81_v55 = vmul.u32 %v79_v52, %v76_v49  ;;  %v82_v56 = vmul.u32 %v78_v51, %v77_v50  ;;  %v80_v59 = vmul.u32 %v78_v51, %v76_v49  ;;  %v83_v61 = vmul.u32 %v79_v52, %v77_v50 }
  0x94   :  { %v106_v63 = vshll.u32 %v103_v57, 16  ;;  %v108_v6 = vshll.u32 %v104_v58, 16  ;;  %v107_v22 = vshrl.u32 %v103_v57, 16  ;;  %v109_v28 = vshrl.u32 %v104_v58, 16 }
  0x95   :  { %v84_v60 = vshll.u32 %v81_v55, 16  ;;  %v86_v0 = vshll.u32 %v82_v56, 16  ;;  %v85_v17 = vshrl.u32 %v81_v55, 16  ;;  %v87_v26 = vshrl.u32 %v82_v56, 16 }
  0x96   :  { %vm110_vm6 = vc.u32 %v102_v62, %v106_v63  ;;  %v112_v8 = vadd.s32 %v106_v63, %v102_v62 }
  0x97   :  { %vm88_vm5 = vc.u32 %v80_v59, %v84_v60  ;;  %v90_v2 = vadd.s32 %v84_v60, %v80_v59  ;;  %v111_v10 = vsel %vm110_vm6, 1, %v244_v1 }
  0x98   :  { %v89_v5 = vsel %vm88_vm5, 1, %v244_v1  ;;  %v113_v14 = vadd.s32 %v111_v10, %v105_v4  ;;  %vm114_vm8 = vc.u32 %v112_v8, %v108_v6  ;;  %v116_v31 = vadd.s32 %v112_v8, %v108_v6 }
  0x99   :  { %v91_v9 = vadd.s32 %v89_v5, %v83_v61  ;;  %vm92_vm7 = vc.u32 %v90_v2, %v86_v0  ;;  %v115_v21 = vsel %vm114_vm8, 1, %v244_v1  ;;  %v15_v5 = vld [vmem:[%s357_s1 + $0x2] sm:$0x1]  ;;  %s251_s1 = smov [#allocation2]  }
  0x9a   :  { %v93_v13 = vsel %vm92_vm7, 1, %v244_v1  ;;  %v117_v23 = vadd.s32 %v115_v21, %v113_v14  ;;  %vm26_vm14 = vcmp.gt.f32.partialorder %v15_v5, 0.5  ;;  %s193_s16 = sshll.u32 %s251_s1, 4  ;;  %s194_s16 = int_to_ptr.vmem [resolvable:$true] %s193_s16 }
  0x9b   :  { %v95_v20 = vadd.s32 %v93_v13, %v91_v9  ;;  %v182_v15 = vsel %vm26_vm14, 1, %v244_v1 }
  0x9c   :  { %v118_v29 = vadd.s32 %v117_v23, %v107_v22  ;;  %v183_v22 = vperm.slane %v182_v15, 0 }
  0x9d   :  { %v96_v27 = vadd.s32 %v95_v20, %v85_v17 }
  0x9e   :  { %v119_v19 = vadd.s32 %v118_v29, %v109_v28  ;;  %vm184_vm1 = vcmp.eq.s32.totalorder %v183_v22, 1 }
  0x9f   :  { %v97_v30 = vadd.s32 %v96_v27, %v87_v26 }
  0xa0   :  { %v123_v32 = vadd.s32 1, %v119_v19 }
  0xa1   :  { %vm122_vm9 = vc.u32 %v97_v30, %v116_v31  ;;  %v121_v18 = vadd.s32 %v116_v31, %v97_v30 }
  0xa2   :  { %v124_v34 = vsel %vm122_vm9, %v123_v32, %v119_v19 }
  0xa3   :  { %v125_v37 = vadd.s32 %v124_v34, %v120_v33 }
  0xa5   :  { %v126_v35 = vadd.s32 536870912, %v125_v37 }
  0xa7   :  { %v127_v38 = vshrl.u32 %v126_v35, 30 }
  0xa9   :  { %v128_v39 = vshll.u32 %v127_v38, 30  ;;  %v151_v59 = vsub.s32 4, %v127_v38 }
  0xab   :  { %v129_v36 = vsub.s32 %v125_v37, %v128_v39  ;;  %v152_v0 = vsel %vm29_vm12, %v151_v59, %v127_v38 }
  0xac   :  { %v154_v11 = vsel %vm338_vm13, 0, %v152_v0 }
  0xad   :  { %vm130_vm10 = vcmp.lt.s32.totalorder %v129_v36, 0  ;;  %v131_v41 = vsub.s32 0, %v129_v36  ;;  %v171_v12 = vadd.s32 3, %v154_v11 }
  0xaf   :  { %v132_v42 = vsel %vm130_vm10, %v131_v41, %v129_v36  ;;  %v172_v21 = vand.u32 3, %v171_v12 }
  0xb0   :  { %v133_v43 = vclz %v132_v42 }
  0xb1   :  { %vm174_vm15 = vcmp.eq.s32.totalorder %v172_v21, 0  ;;  %vm177_vm0 = vcmp.eq.s32.totalorder %v172_v21, 2  ;;  %vm173_vm2 = vcmp.lt.s32.totalorder %v172_v21, 2 }
  0xb2   :  { %v205_v44 = vadd.s32 4294967294, %v133_v43 }
  0xb4   :  { %vm206_vm11 = vcmp.lt.s32.totalorder %v205_v44, 0 }
  0xb5   :  { %v136_v45 = vsel %vm206_vm11, 0, %v205_v44 }
  0xb6   :  { %v137_v46 = vsub.s32 32, %v136_v45  ;;  %v141_v47 = vsub.s32 4294967266, %v136_v45  ;;  %v138_v48 = vshll.u32 %v129_v36, %v136_v45 }
  0xb8   :  { %v139_v49 = vshrl.u32 %v121_v18, %v137_v46  ;;  %v142_v50 = vadd.s32 127, %v141_v47 }
  0xba   :  { %v140_v40 = vor.u32 %v139_v49, %v138_v48  ;;  %v143_v51 = vshll.u32 %v142_v50, 23 }
  0xbc   :  { %v144_v52 = vor.u32 4788187, %v143_v51  ;;  %v147_v54 = vcvt.s32.f32 %v140_v40 }
  0xbe   :  { %v145_v53 = vand.u32 2147483647, %v144_v52 }
  0xc0   :  { %v148_v55 = vmul.f32 %v147_v54, %v145_v53 }
  0xc2   :  { %v149_v56 = vxor.u32 2147483648, %v148_v55 }
  0xc4   :  { %v150_v58 = vsel %vm29_vm12, %v149_v56, %v148_v55 }
  0xc5   :  { %v153_v60 = vsel %vm338_vm13, %v280_v7, %v150_v58 }
  0xc6   :  { %v155_v61 = vmul.f32 %v153_v60, %v153_v60 }
  0xc8   :  { %v156_v62 = vmul.f32 -0.001358992, %v155_v61  ;;  %v163_v63 = vmul.f32 -0.00019511016, %v155_v61 }
  0xca   :  { %v157_v2 = vadd.f32 0.041655596, %v156_v62  ;;  %v164_v4 = vadd.f32 0.008332121, %v163_v63 }
  0xcc   :  { %v158_v6 = vmul.f32 %v157_v2, %v155_v61  ;;  %v165_v8 = vmul.f32 %v164_v4, %v155_v61 }
  0xce   :  { %v159_v9 = vadd.f32 -0.4999988, %v158_v6  ;;  %v166_v10 = vadd.f32 -0.16666654, %v165_v8 }
  0xd0   :  { %v160_v13 = vmul.f32 %v159_v9, %v155_v61  ;;  %v167_v14 = vmul.f32 %v166_v10, %v155_v61 }
  0xd2   :  { %v161_v17 = vadd.f32 1.0, %v160_v13  ;;  %v168_v20 = vadd.f32 1.0, %v167_v14 }
  0xd4   :  { %v169_v23 = vmul.f32 %v168_v20, %v153_v60  ;;  %v178_v24 = vxor.u32 2147483648, %v161_v17 }
  0xd6   :  { %v175_v25 = vxor.u32 2147483648, %v169_v23  ;;  %v179_v27 = vsel %vm177_vm0, %v178_v24, %v169_v23 }
  0xd8   :  { %v176_v26 = vsel %vm174_vm15, %v161_v17, %v175_v25 }
  0xd9   :  { %v180_v1 = vsel %vm173_vm2, %v176_v26, %v179_v27 }
  0xda   :  { %v181_v28 = vsel %vm170_vm4, nan, %v180_v1 }
  0xdb   :  { %v185_v29 = vsel %vm184_vm1, %v274_v3, %v181_v28 }
  0xdc   :  { %187 = vst.msk [vmem:[#allocation2] sm:$0xff] %vm186_vm3, %v185_v29 }
  0xdd   :  { %198 = dma.vmem_to_hbm [thread:$0]  %s194_s16, 128, %s196_s19, [#allocation3]  }
  0xde   :  { %242 = dma.done.wait [#allocation3], 128  }
  0xdf   :  { %243 = vsyncadd [#allocation3], 4294967168 }
  0xe0   :  { %203 = vsyncpa [#allocation3], 1 }

</bundles_post_ra>
